<compile_context>
chip_gen: v7x
topology: tpu7x:2x2x1
jax: 0.10.0
libtpu: 0.0.40
codegen_flags: <defaults>
</compile_context>

<pallas_src>
import functools

import jax
import jax.numpy as jnp
from jax.experimental import pallas as pl
from jax.experimental.pallas import tpu as pltpu


def _round_up(x, m):
    return ((x + m - 1) // m) * m


def _sublane(dtype):
    """Rows per packed sublane: 8 for f32, 16 for bf16, 32 for int8/fp8."""
    return max(8, 32 // max(1, jnp.dtype(dtype).itemsize))


def _vmem_capacity_bytes():
    """Physical VMEM of the current chip; conservative fallback = 64 MiB (v7x)."""
    try:
        info = pltpu.get_tpu_info()
        cap = getattr(info, "vmem_capacity_bytes", None)
        if cap:
            return int(cap)
    except Exception:
        pass
    return 64 * 1024 * 1024


def _pick_hidden_tile(hidden, target, align=128):
    """Hidden tile: full hidden if small; else the largest multiple of `align`
    <= target dividing hidden; else the target tile itself (the wrapper then
    zero-pads the weights along hidden — no full-weight VMEM cliff)."""
    if hidden <= target:
        return hidden
    t = (target // align) * align
    fallback = max(t, align)
    while t >= align:
        if hidden % t == 0:
            return t
        t -= align
    return fallback


def _vmem_estimate(br, d_model, th, x_itemsize, w_itemsize):
    dbl = 2  # default double-buffering of pipelined operands
    est = 0
    est += dbl * br * d_model * x_itemsize      # x tile
    est += dbl * d_model * th * w_itemsize      # w1 tile
    est += dbl * th * w_itemsize                # b1 tile
    est += dbl * th * d_model * w_itemsize      # w2 tile
    est += dbl * d_model * w_itemsize           # b2 tile
    est += dbl * br * d_model * x_itemsize      # out tile
    est += br * d_model * 4                     # f32 accumulator scratch
    est += br * th * 4                          # intermediate h (f32)
    est += br * d_model * 4                     # partial second-matmul result
    return est


def ffn_kernel(x_ref, w1_ref, b1_ref, w2_ref, b2_ref, o_ref, acc_ref, *, nk):
    """Grid point (i, k): row tile i, hidden slice k.

    Accumulates relu(x @ W1[:, k] + b1[k]) @ W2[k, :] into acc; adds b2 and
    stores on the last hidden slice.  nk is the (static) number of hidden
    slices so the single-slice case skips the accumulator entirely.
    """
    k = pl.program_id(1)

    # linear1 (MXU, native-dtype operands, f32 accumulation) + bias + ReLU.
    h = jnp.dot(x_ref[...], w1_ref[...], preferred_element_type=jnp.float32)
    h = jnp.maximum(h + b1_ref[...].astype(jnp.float32), 0.0)

    # TODO(synk): dropout is identity in eval mode; a training-mode mask via
    # pltpu.prng_seed + pltpu.prng_random_bits could be applied to `h` here.

    # Partial linear2 contribution (f32).
    partial = jnp.dot(h.astype(w2_ref.dtype), w2_ref[...],
                      preferred_element_type=jnp.float32)

    if nk == 1:
        o_ref[...] = (partial + b2_ref[...].astype(jnp.float32)).astype(o_ref.dtype)
    else:
        @pl.when(k == 0)
        def _first():
            acc_ref[...] = partial            # no zero-fill pass

        @pl.when(jnp.logical_and(k > 0, k < nk - 1))
        def _middle():
            acc_ref[...] += partial

        @pl.when(k == nk - 1)
        def _last():                          # no extra acc store+reload
            o_ref[...] = (acc_ref[...] + partial
                          + b2_ref[...].astype(jnp.float32)).astype(o_ref.dtype)


@functools.partial(jax.jit, static_argnames=("block_rows", "block_hidden"))
def positionwise_feed_forward(x, w1, b1, w2, b2, *, block_rows=512,
                              block_hidden=512):
    """x: (B, S, d_model); w1: (d_model, hidden); w2: (hidden, d_model)."""
    B, S, d_model = x.shape
    hidden = w1.shape[1]
    rows = B * S

    sub = _sublane(x.dtype)
    br = min(_round_up(block_rows, sub), _round_up(rows, sub))
    th = _pick_hidden_tile(hidden, block_hidden)

    # Hardware-aware VMEM budget; shrink th (DMA granularity only) before br
    # (which sets the weight-reuse roofline).
    budget = int(0.85 * _vmem_capacity_bytes())
    x_it = jnp.dtype(x.dtype).itemsize
    w_it = jnp.dtype(w1.dtype).itemsize
    while _vmem_estimate(br, d_model, th, x_it, w_it) > budget:
        if th > 128:
            th = max(128, ((th // 2) // 128) * 128)
        elif br > sub:
            br = max(sub, _round_up(br // 2, sub))
        else:
            break

    hidden_p = _round_up(hidden, th)
    grid_k = hidden_p // th

    x2d = x.reshape(rows, d_model)
    b1_2d = b1.reshape(1, hidden)
    b2_2d = b2.reshape(1, d_model)
    if hidden_p != hidden:
        # Zero-pad the hidden (reduction) dim only; exact through
        # relu(x @ 0 + 0) = 0 followed by 0 @ W2_pad_rows = 0.
        ph = hidden_p - hidden
        w1 = jnp.pad(w1, ((0, 0), (0, ph)))
        b1_2d = jnp.pad(b1_2d, ((0, 0), (0, ph)))
        w2 = jnp.pad(w2, ((0, ph), (0, 0)))

    grid = (pl.cdiv(rows, br), grid_k)

    est = _vmem_estimate(br, d_model, th, x_it, w_it)
    vmem_limit = int(min(budget, max(int(1.3 * est), 32 * 1024 * 1024)))

    out2d = pl.pallas_call(
        functools.partial(ffn_kernel, nk=grid_k),
        out_shape=jax.ShapeDtypeStruct((rows, d_model), x.dtype),
        grid_spec=pltpu.PrefetchScalarGridSpec(
            num_scalar_prefetch=0,
            grid=grid,
            in_specs=[
                # Row tile of activations (constant along hidden -> no
                # redundant DMA across the reduction axis).
                pl.BlockSpec((br, d_model), lambda i, k: (i, 0)),
                # Hidden-sliced weights / biases (bounded weight VMEM).
                pl.BlockSpec((d_model, th), lambda i, k: (0, k)),
                pl.BlockSpec((1, th), lambda i, k: (0, k)),
                pl.BlockSpec((th, d_model), lambda i, k: (k, 0)),
                pl.BlockSpec((1, d_model), lambda i, k: (0, 0)),
            ],
            out_specs=pl.BlockSpec((br, d_model), lambda i, k: (i, 0)),
            scratch_shapes=[pltpu.VMEM((br, d_model), jnp.float32)],
        ),
        compiler_params=pltpu.CompilerParams(
            dimension_semantics=("parallel", "arbitrary"),
            vmem_limit_bytes=vmem_limit,
        ),
    )(x2d, w1, b1_2d, w2, b2_2d)

    return out2d.reshape(B, S, d_model)


def init_params(key, d_model, hidden, dtype=jnp.float32):
    """Deterministic init mimicking nn.Linear's U(-1/sqrt(fan_in), ...).

    Weights are returned pre-transposed as (in_features, out_features).
    """
    k1, k2, k3, k4 = jax.random.split(key, 4)
    bound1 = 1.0 / (d_model ** 0.5)
    bound2 = 1.0 / (hidden ** 0.5)
    w1 = jax.random.uniform(k1, (d_model, hidden), dtype, -bound1, bound1)
    b1 = jax.random.uniform(k2, (hidden,), dtype, -bound1, bound1)
    w2 = jax.random.uniform(k3, (hidden, d_model), dtype, -bound2, bound2)
    b2 = jax.random.uniform(k4, (d_model,), dtype, -bound2, bound2)
    return w1, b1, w2, b2


if __name__ == "__main__":
    key = jax.random.PRNGKey(0)
    kx, kp = jax.random.split(key)

    # Small shapes consistent with the module's forward.
    batch, seq, d_model, hidden = 2, 8, 32, 64
    x = jax.random.normal(kx, (batch, seq, d_model), dtype=jnp.float32)
    w1, b1, w2, b2 = init_params(kp, d_model, hidden)

    out = jax.block_until_ready(positionwise_feed_forward(x, w1, b1, w2, b2))

    # Pure-JAX reference (dropout is identity in eval mode).
    ref = jnp.maximum(x @ w1 + b1, 0.0) @ w2 + b2
    assert out.shape == (batch, seq, d_model)
    assert jnp.allclose(out, ref, atol=1e-5, rtol=1e-5)

    # Ragged rows (B*S not a multiple of the row tile) + non-128 hidden:
    # exercises the masked boundary-block store path (no wrapper pad/slice).
    batch2, seq2, dm2, hid2 = 3, 5, 32, 96
    kx2, kp2 = jax.random.split(kp)
    x2 = jax.random.normal(kx2, (batch2, seq2, dm2), dtype=jnp.float32)
    p2 = init_params(kp2, dm2, hid2)
    out2 = jax.block_until_ready(positionwise_feed_forward(x2, *p2))
    ref2 = jnp.maximum(x2 @ p2[0] + p2[1], 0.0) @ p2[2] + p2[3]
    assert out2.shape == (batch2, seq2, dm2)
    assert jnp.allclose(out2, ref2, atol=1e-5, rtol=1e-5)

    # bf16 operands flow to the MXU natively (no in-kernel upcast); compare
    # loosely against the f32 reference — bf16 rounding, not a bug.
    xb = x.astype(jnp.bfloat16)
    w1b, b1b, w2b, b2b = (t.astype(jnp.bfloat16) for t in (w1, b1, w2, b2))
    out_bf16 = jax.block_until_ready(
        positionwise_feed_forward(xb, w1b, b1b, w2b, b2b)
    )
    assert out_bf16.dtype == jnp.bfloat16
    assert jnp.allclose(out_bf16.astype(jnp.float32), ref, atol=1e-1, rtol=1e-1)

    print("KERNEL_OK")
</pallas_src>

<mosaic_0001>
module attributes {stable_mosaic.version = 11 : i64} {
  func.func @ffn_kernel(%arg0: i32, %arg1: i32, %arg2: memref<16x32xf32, #tpu.memory_space<vmem>>, %arg3: memref<32x64xf32, #tpu.memory_space<vmem>>, %arg4: memref<1x64xf32, #tpu.memory_space<vmem>>, %arg5: memref<64x32xf32, #tpu.memory_space<vmem>>, %arg6: memref<1x32xf32, #tpu.memory_space<vmem>>, %arg7: memref<16x32xf32, #tpu.memory_space<vmem>>, %arg8: memref<16x32xf32, #tpu.memory_space<vmem>>) attributes {dimension_semantics = [#tpu.dimension_semantics<parallel>, #tpu.dimension_semantics<arbitrary>], iteration_bounds = array<i64: 1, 1>, scalar_prefetch = 0 : i64, scratch_operands = 1 : i64, tpu.core_type = #tpu.core_type<tc>, window_params = [{transform_indices = @transform_0, window_bounds = array<i64: 16, 32>}, {transform_indices = @transform_1, window_bounds = array<i64: 32, 64>}, {transform_indices = @transform_2, window_bounds = array<i64: 1, 64>}, {transform_indices = @transform_3, window_bounds = array<i64: 64, 32>}, {pipeline_mode = #tpu.pipeline_mode<synchronous>, transform_indices = @transform_4, window_bounds = array<i64: 1, 32>}, {transform_indices = @transform_5, window_bounds = array<i64: 16, 32>}]} {
    %c0 = arith.constant 0 : index
    %c0_0 = arith.constant 0 : index
    %0 = vector.load %arg2[%c0, %c0_0] : memref<16x32xf32, #tpu.memory_space<vmem>>, vector<16x32xf32>
    %c0_1 = arith.constant 0 : index
    %c0_2 = arith.constant 0 : index
    %1 = vector.load %arg3[%c0_1, %c0_2] : memref<32x64xf32, #tpu.memory_space<vmem>>, vector<32x64xf32>
    %cst = arith.constant dense<0.000000e+00> : vector<16x64xf32>
    %2 = tpu.matmul %0, %1, %cst {dimension_numbers = #tpu.dot_dimension_numbers<[1], [0], [0], [1], [0, 0, 1, 1], [], []>} : vector<16x32xf32>, vector<32x64xf32>, vector<16x64xf32> -> vector<16x64xf32>
    %c0_3 = arith.constant 0 : index
    %c0_4 = arith.constant 0 : index
    %3 = vector.load %arg4[%c0_3, %c0_4] : memref<1x64xf32, #tpu.memory_space<vmem>>, vector<1x64xf32>
    %4 = vector.broadcast %3 : vector<1x64xf32> to vector<16x64xf32>
    %5 = arith.addf %2, %4 : vector<16x64xf32>
    %cst_5 = arith.constant 0.000000e+00 : f32
    %6 = vector.broadcast %cst_5 : f32 to vector<16x64xf32>
    %7 = arith.maximumf %5, %6 : vector<16x64xf32>
    %c0_6 = arith.constant 0 : index
    %c0_7 = arith.constant 0 : index
    %8 = vector.load %arg5[%c0_6, %c0_7] : memref<64x32xf32, #tpu.memory_space<vmem>>, vector<64x32xf32>
    %cst_8 = arith.constant dense<0.000000e+00> : vector<16x32xf32>
    %9 = tpu.matmul %7, %8, %cst_8 {dimension_numbers = #tpu.dot_dimension_numbers<[1], [0], [0], [1], [0, 0, 1, 1], [], []>} : vector<16x64xf32>, vector<64x32xf32>, vector<16x32xf32> -> vector<16x32xf32>
    %c0_9 = arith.constant 0 : index
    %c0_10 = arith.constant 0 : index
    %10 = vector.load %arg6[%c0_9, %c0_10] : memref<1x32xf32, #tpu.memory_space<vmem>>, vector<1x32xf32>
    %11 = vector.broadcast %10 : vector<1x32xf32> to vector<16x32xf32>
    %12 = arith.addf %9, %11 : vector<16x32xf32>
    %c0_11 = arith.constant 0 : index
    %c0_12 = arith.constant 0 : index
    %13 = vector.load %arg7[%c0_11, %c0_12] : memref<16x32xf32, #tpu.memory_space<vmem>>, vector<16x32xf32>
    tpu.vector_store %arg7[%c0_11, %c0_12], %12 {strides = array<i32>} : memref<16x32xf32, #tpu.memory_space<vmem>>, vector<16x32xf32>,
    return
  }
  func.func @transform_0(%arg0: i32, %arg1: i32) -> (i32, i32) {
    %c0_i32 = arith.constant 0 : i32
    %c0_i32_0 = arith.constant 0 : i32
    return %arg0, %c0_i32 : i32, i32
  }
  func.func @transform_1(%arg0: i32, %arg1: i32) -> (i32, i32) {
    %c0_i32 = arith.constant 0 : i32
    %c0_i32_0 = arith.constant 0 : i32
    return %c0_i32, %arg1 : i32, i32
  }
  func.func @transform_2(%arg0: i32, %arg1: i32) -> (i32, i32) {
    %c0_i32 = arith.constant 0 : i32
    %c0_i32_0 = arith.constant 0 : i32
    return %c0_i32, %arg1 : i32, i32
  }
  func.func @transform_3(%arg0: i32, %arg1: i32) -> (i32, i32) {
    %c0_i32 = arith.constant 0 : i32
    %c0_i32_0 = arith.constant 0 : i32
    return %arg1, %c0_i32 : i32, i32
  }
  func.func @transform_4(%arg0: i32, %arg1: i32) -> (i32, i32) {
    %c0_i32 = arith.constant 0 : i32
    %c0_i32_0 = arith.constant 0 : i32
    %c0_i32_1 = arith.constant 0 : i32
    return %c0_i32, %c0_i32_0 : i32, i32
  }
  func.func @transform_5(%arg0: i32, %arg1: i32) -> (i32, i32) {
    %c0_i32 = arith.constant 0 : i32
    %c0_i32_0 = arith.constant 0 : i32
    return %arg0, %c0_i32 : i32, i32
  }
}

</mosaic_0001>

<bundles_post_ra>
// kernel: positionwise_feed_forward.1
= control target key start
LH: loop header
LB: loop body
LE: loop exit
PB: predicated region body
PF: predicated region fallthrough
CT: control target
= control target key end

     0   :  { %vm34_vm0 = vcmask 261120   ;;  %s433_s0 = inlined_call_operand.vmem [shape: f32[16,32], index: 0, kind: input, shape index: {}]   ;;  %s434_s1 = inlined_call_operand.vmem [shape: f32[32,64], index: 1, kind: input, shape index: {}]   ;;  %s435_s2 = inlined_call_operand.vmem [shape: f32[1,64], index: 2, kind: input, shape index: {}]   ;;  %s436_s3 = inlined_call_operand.vmem [shape: f32[64,32], index: 3, kind: input, shape index: {}]   ;;  %s437_s4 = inlined_call_operand.vmem [shape: f32[1,32], index: 4, kind: input, shape index: {}]   ;;  %s438_s5 = inlined_call_operand.hbm [shape: f32[16,32], index: 5, kind: output, shape index: {}]  }
   0x1   :  { %v23_v0 = vld [vmem:[%s434_s1] sm:$0xff]  ;;  %v24_v1 = vld [vmem:[%s434_s1 + $0x8] sm:$0xff]  ;;  %v25_v2 = vld [vmem:[%s434_s1 + $0x10] sm:$0xff] }
   0x2   :  { %v285_v3 = vpack.c.bf16 %v24_v1, %v23_v0  ;;  %v26_v4 = vld [vmem:[%s434_s1 + $0x18] sm:$0xff]  ;;  %v21_v5 = vld [vmem:[%s433_s0] sm:$0xff]  ;;  %v119_v8 = vld [vmem:[%s436_s3 + $0x8] sm:$0xff] }
   0x3   :  { %v289_v6 = vpack.c.bf16 %v26_v4, %v25_v2  ;;  %263 = vmatprep.mubr.msk.f32.mxu0 %vm34_vm0, %v21_v5  ;;  %v118_v7 = vld [vmem:[%s436_s3] sm:$0xff]  ;;  %v120_v9 = vld [vmem:[%s436_s3 + $0x10] sm:$0xff]  ;;  %v121_v11 = vld [vmem:[%s436_s3 + $0x18] sm:$0xff] }
   0x4   :  { %286 = vmatprep.subr.bf16.mxu0 %v285_v3  ;;  %v293_v10 = vpack.c.bf16 %v119_v8, %v118_v7  ;;  %v297_v12 = vpack.c.bf16 %v121_v11, %v120_v9  ;;  %v122_v13 = vld [vmem:[%s436_s3 + $0x20] sm:$0xff]  ;;  %v123_v14 = vld [vmem:[%s436_s3 + $0x28] sm:$0xff] }
   0x5   :  { %288 = vmatpush3.bf16.msra.mxu0 %v285_v3 }
   0x6   :  { %10 = vsyncpa [#allocation4], 0  ;;  %290 = vmatprep.subr.bf16.mxu0 %v289_v6  ;;  %294 = vmatprep.subr.bf16.mxu1 %v293_v10  ;;  %v301_v15 = vpack.c.bf16 %v123_v14, %v122_v13  ;;  %v22_v16 = vld [vmem:[%s433_s0 + $0x8] sm:$0xff]  ;;  %v124_v17 = vld [vmem:[%s436_s3 + $0x30] sm:$0xff]  ;;  %vm133_vm1 = vcmask 523264  }
   0x7   :  { %296 = vmatpush3.bf16.msra.mxu1 %v293_v10  ;;  %v125_v18 = vld [vmem:[%s436_s3 + $0x38] sm:$0xff]  ;;  %v233_v20 = vld [vmem:[%s435_s2] ss:$0 sm:$0xff]  ;;  %s336_s3 = smov [#allocation3]  }
   0x8   :  { %298 = vmatprep.subr.bf16.mxu1 %v297_v12  ;;  %v305_v19 = vpack.c.bf16 %v125_v18, %v124_v17  ;;  %v236_v27 = vld [vmem:[%s437_s4] ss:$0 sm:$0xff]  ;;  %s222_s23 = sshll.u32 %s336_s3, 4  ;;  %s223_s23 = int_to_ptr.vmem [resolvable:$true] %s222_s23 }
   0x9   :  { %292 = vmatpush3.bf16.msra.mxu0 %v289_v6  ;;  %s312_s2 = scalar_lea.vmem %s223_s23, 256  ;;  %p317_p1 = scmp.lt.s32.totalorder %s223_s23, %s223_s23 }
   0xa   :  { %p313_p0 = scmp.ne.s32.totalorder %s223_s23, %s312_s2  ;;  %p318_p2 = scmp.lt.s32.totalorder %s312_s2, %s312_s2 }
   0xb   :  { %300 = vmatpush3.bf16.msra.mxu1 %v297_v12 }
   0xc   :  { %264 = vmatmul.mubr.msk.f32.vlgmr.msra.gmra.mrb[0].mxu0 %vm34_vm0, %v22_v16  ;;  %302 = vmatprep.subr.bf16.mxu1 %v301_v15  ;;  %p319_p3 = por %p318_p2, %p317_p1 }
   0xe   :  { %p320_p4 = pnand %p319_p3, %p313_p0 }
   0xf   :  { %304 = vmatpush3.bf16.msra.mxu1 %v301_v15 }
  0x10   :  { %306 = vmatprep.subr.bf16.mxu1 %v305_v19 }
  0x13   :  { %308 = vmatpush3.bf16.msra.mxu1 %v305_v19 }
  0xdf   :  { %v265_v21 = vpop.f32.mrb[0].mxu0 }
  0xe0   :  { %v113_v22 = vadd.f32 %v265_v21, %v233_v20  ;;  %v107_v23 = vpop.f32.mrb[1].mxu0 }
  0xe1   :  { %v108_v24 = vadd.f32 %v233_v20, %v107_v23 }
  0xe2   :  { %v117_v26 = vmax.f32 %v113_v22, 0.0 }
  0xe3   :  { %v116_v25 = vmax.f32 %v108_v24, 0.0 }
  0xe5   :  { %282 = vmatprep.mubr.msk.f32.mxu1 %vm133_vm1, %v116_v25 }
  0xe6   :  { %283 = vmatmul.mubr.msk.f32.vlgmr.msra.gmra.mrb[0].mxu1 %vm133_vm1, %v117_v26 }
 0x1b9   :  { %v284_v28 = vpop.f32.mrb[0].mxu1 }
 0x1ba   :  { %v212_v29 = vadd.f32 %v284_v28, %v236_v27  ;;  %v206_v30 = vpop.f32.mrb[1].mxu1 }
 0x1bb   :  { %v207_v31 = vadd.f32 %v236_v27, %v206_v30 }
 0x1bc   :  { %216 = vst.msk [vmem:[#allocation3 + $0x8] sm:$0xff] %vm34_vm0, %v212_v29 }
 0x1bd   :  { %215 = vst.msk [vmem:[#allocation3] sm:$0xff] %vm34_vm0, %v207_v31 }
 0x1be   :  { %323 = shalt.err (!%p320_p4)
}
 0x1bf   :  { %s324_s25 = scalar_lea.hbm %s438_s5, 256 }
 0x1c0   :  { %p325_p5 = scmp.ne.s32.totalorder %s438_s5, %s324_s25  ;;  %p328_p6 = scmp.lt.u32.totalorder %s324_s25, %s438_s5 }
 0x1c2   :  { %p330_p7 = pnand %p328_p6, %p325_p5 }
 0x1c4   :  { %333 = shalt.err (!%p330_p7)
}
 0x1c5   :  { %s337_s30 = smov 128   ;;  %s338_s6 = smov 8  }
 0x1c6   :  { %228 = dma.vmem_to_hbm [thread:$0]  %s223_s23, 256, %s438_s5, [#allocation4], %s337_s30, %s337_s30, %s338_s6  }
 0x1c7   :  { %334 = dma.done.wait [#allocation4], 256  }
 0x1c8   :  { %335 = vsyncadd [#allocation4], 4294967040 }
 0x1c9   :  { %232 = vsyncpa [#allocation4], 1 }

</bundles_post_ra>
